<compile_context>
chip_gen: v7x
topology: tpu7x:2x2x1
jax: 0.10.0
libtpu: 0.0.40
codegen_flags: <defaults>
</compile_context>

<pallas_src>
import functools
import math

import jax
import jax.numpy as jnp
from jax.experimental import pallas as pl
from jax.experimental.pallas import tpu as pltpu


def _round_up(x: int, m: int) -> int:
    return -(-x // m) * m


def _fused_kernel(e_ref, w1_ref, w2_ref, out_ref, *, c: int):
    # Stage 1: one MXU pass over the embedding tile.  E arrives f32 and is cast
    # to bf16 here (no extra HBM pass over E); accumulate in f32.
    e = e_ref[...].astype(jnp.bfloat16)
    h = jnp.dot(e, w1_ref[...], preferred_element_type=jnp.float32)     # [T,128]
    h = jnp.where(h > 0, h, 0.3 * h)                                    # LeakyReLU(0.3), f32 VPU
    # Stage 2: bf16 MXU dot routes H[:, 64:128] through W_model2 into lanes [0,C).
    y = jnp.dot(h.astype(jnp.bfloat16), w2_ref[...],
                preferred_element_type=jnp.float32)                     # [T,128]
    # scores_mlp already sits (in f32) at lanes [C,2C) of H -- lane-select it
    # into the output slab so it skips the second matmul's bf16 rounding.
    lane = jax.lax.broadcasted_iota(jnp.int32, h.shape, 1)
    take_h = (lane >= c) & (lane < 2 * c)
    out_ref[...] = jnp.where(take_h, h, y).astype(out_ref.dtype)


def pack_weights(w_model, w_model2, w_mlp, *, embed_dim):
    """One-time layout plumbing (per parameter update, NOT per forward call).

    W1 [D,128]: lanes [C,2C) rows[:embed_dim] = W_mlp ; lanes [128-64,128) = W_model.
    W2 [128,128]: rows [128-64,128), lanes [0,C) = W_model2.
    """
    d, hidden = w_model.shape
    c = w_mlp.shape[1]
    assert w_model2.shape == (hidden, c)
    assert w_mlp.shape[0] == embed_dim and embed_dim <= d
    assert 2 * c + hidden <= 128, "fused output slab assumes 2*C + 64 <= 128"
    col0 = 128 - hidden
    w1 = jnp.zeros((d, 128), jnp.float32)
    w1 = w1.at[:, col0:].set(w_model.astype(jnp.float32))
    w1 = w1.at[:embed_dim, c:2 * c].set(w_mlp.astype(jnp.float32))
    w2 = jnp.zeros((128, 128), jnp.float32)
    w2 = w2.at[col0:, :c].set(w_model2.astype(jnp.float32))
    return w1.astype(jnp.bfloat16), w2.astype(jnp.bfloat16), c


def model_forward(embedding, w1_packed, w2_packed, *, num_classes,
                  tile_n: int = 1024):
    """Fused two-branch forward, gridded over the node axis."""
    n, d = embedding.shape
    c = num_classes
    assert w1_packed.shape == (d, 128) and w2_packed.shape == (128, 128)

    # Node-axis tiling: big tiles for HBM-roofline efficiency, >=2 blocks for
    # mid/large N (v7x megacore), one tight (possibly ragged) block for tiny N.
    tile_n = max(16, min(tile_n, _round_up(n, 16)))
    if n > 256:
        tile_n = min(tile_n, _round_up(pl.cdiv(n, 2), 128))
    grid = (pl.cdiv(n, tile_n),)   # ragged last block; no jnp.pad copy of E

    out = pl.pallas_call(
        functools.partial(_fused_kernel, c=c),
        out_shape=jax.ShapeDtypeStruct((n, 128), jnp.bfloat16),
        grid_spec=pltpu.PrefetchScalarGridSpec(
            num_scalar_prefetch=0,
            grid=grid,
            in_specs=[
                pl.BlockSpec((tile_n, d), lambda i: (i, 0)),     # E tile (f32)
                pl.BlockSpec((d, 128), lambda i: (0, 0)),        # W1 resident (bf16)
                pl.BlockSpec((128, 128), lambda i: (0, 0)),      # W2 resident (bf16)
            ],
            out_specs=pl.BlockSpec((tile_n, 128), lambda i: (i, 0)),
        ),
        compiler_params=pltpu.CompilerParams(
            dimension_semantics=("parallel",)),
    )(embedding, w1_packed, w2_packed)

    # One contiguous slice of the 2C useful columns; split after (cheap).
    scores = out[:, : 2 * c].astype(jnp.float32)
    return scores[:, :c], scores[:, c:]


def xavier_uniform(key, shape, dtype=jnp.float32):
    fan_in, fan_out = shape[0], shape[1]
    bound = math.sqrt(6.0 / (fan_in + fan_out))
    return jax.random.uniform(key, shape, dtype, minval=-bound, maxval=bound)


if __name__ == "__main__":
    # Hyper-params consistent with MODEL.__init__.
    K = 2
    num_classes = 2
    embed_dim = 32
    D = (int(math.pow(2, K + 1)) - 1) * embed_dim   # 224
    N = 8                                           # number of nodes (batch)

    key = jax.random.PRNGKey(0)
    k_emb, k_mlp, k_m, k_m2 = jax.random.split(key, 4)

    # agg(nodes) output (kernel input).
    embedding = jax.random.normal(k_emb, (N, D), dtype=jnp.float32)

    # Xavier-uniform parameters (matching init.xavier_uniform_ shapes).
    w_mlp = xavier_uniform(k_mlp, (embed_dim, num_classes))
    w_model = xavier_uniform(k_m, (D, 64))
    w_model2 = xavier_uniform(k_m2, (64, num_classes))

    # Weight packing hoisted out of the per-call path (once per param update).
    w1_packed, w2_packed, c = pack_weights(w_model, w_model2, w_mlp,
                                           embed_dim=embed_dim)

    scores_model, scores_mlp = model_forward(
        embedding, w1_packed, w2_packed, num_classes=c)
    jax.block_until_ready((scores_model, scores_mlp))

    # ---- References ----------------------------------------------------------
    hi = jax.lax.Precision.HIGHEST

    def leaky(x):
        return jnp.where(x > 0, x, 0.3 * x)

    def f32(x):
        return x.astype(jnp.float32)

    # (a) Quantization-aware reference mirroring the kernel's bf16 rounding
    #     points (E, W1, W2 and H rounded to bf16; f32 accumulate) -- tight-ish
    #     check; only the final bf16 output store is unmirrored (covered by tol).
    e_q = f32(embedding.astype(jnp.bfloat16))
    wm_q = f32(w_model.astype(jnp.bfloat16))
    wm2_q = f32(w_model2.astype(jnp.bfloat16))
    wmlp_q = f32(w_mlp.astype(jnp.bfloat16))
    h_q = leaky(jnp.dot(e_q, wm_q, precision=hi))
    ref_model_q = jnp.dot(f32(h_q.astype(jnp.bfloat16)), wm2_q, precision=hi)
    ref_mlp_q = leaky(jnp.dot(e_q[:, :embed_dim], wmlp_q, precision=hi))
    assert jnp.allclose(scores_model, ref_model_q, atol=2e-2, rtol=1e-2)
    assert jnp.allclose(scores_mlp, ref_mlp_q, atol=2e-2, rtol=1e-2)

    # (b) Full-f32 module-semantics reference -- loose check covering the bf16
    #     quantization at the kernel's I/O boundaries.
    ref_model = jnp.dot(leaky(jnp.dot(embedding, w_model, precision=hi)),
                        w_model2, precision=hi)
    ref_mlp = leaky(jnp.dot(embedding[:, :embed_dim], w_mlp, precision=hi))
    assert jnp.allclose(scores_model, ref_model, atol=8e-2, rtol=5e-2)
    assert jnp.allclose(scores_mlp, ref_mlp, atol=8e-2, rtol=5e-2)

    print("KERNEL_OK")
</pallas_src>

<mosaic_0001>
module attributes {stable_mosaic.version = 11 : i64} {
  func.func @_fused_kernel(%arg0: i32, %arg1: memref<16x224xf32, #tpu.memory_space<vmem>>, %arg2: memref<224x128xbf16, #tpu.memory_space<vmem>>, %arg3: memref<128x128xbf16, #tpu.memory_space<vmem>>, %arg4: memref<16x128xbf16, #tpu.memory_space<vmem>>) attributes {dimension_semantics = [#tpu.dimension_semantics<parallel>], iteration_bounds = array<i64: 1>, scalar_prefetch = 0 : i64, scratch_operands = 0 : i64, tpu.core_type = #tpu.core_type<tc>, window_params = [{transform_indices = @transform_0, window_bounds = array<i64: 16, 224>}, {pipeline_mode = #tpu.pipeline_mode<synchronous>, transform_indices = @transform_1, window_bounds = array<i64: 224, 128>}, {pipeline_mode = #tpu.pipeline_mode<synchronous>, transform_indices = @transform_2, window_bounds = array<i64: 128, 128>}, {transform_indices = @transform_3, window_bounds = array<i64: 16, 128>}]} {
    %c0 = arith.constant 0 : index
    %c0_0 = arith.constant 0 : index
    %0 = vector.load %arg1[%c0, %c0_0] : memref<16x224xf32, #tpu.memory_space<vmem>>, vector<16x224xf32>
    %1 = arith.truncf %0 : vector<16x224xf32> to vector<16x224xbf16>
    %c0_1 = arith.constant 0 : index
    %c0_2 = arith.constant 0 : index
    %2 = vector.load %arg2[%c0_1, %c0_2] : memref<224x128xbf16, #tpu.memory_space<vmem>>, vector<224x128xbf16>
    %cst = arith.constant dense<0.000000e+00> : vector<16x128xf32>
    %3 = tpu.matmul %1, %2, %cst {dimension_numbers = #tpu.dot_dimension_numbers<[1], [0], [0], [1], [0, 0, 1, 1], [], []>} : vector<16x224xbf16>, vector<224x128xbf16>, vector<16x128xf32> -> vector<16x128xf32>
    %cst_3 = arith.constant 0.000000e+00 : f32
    %4 = vector.broadcast %cst_3 : f32 to vector<16x128xf32>
    %5 = arith.cmpf ogt, %3, %4 : vector<16x128xf32>
    %cst_4 = arith.constant 3.000000e-01 : f32
    %6 = vector.broadcast %cst_4 : f32 to vector<16x128xf32>
    %7 = arith.mulf %6, %3 : vector<16x128xf32>
    %8 = arith.select %5, %3, %7 : vector<16x128xi1>, vector<16x128xf32>
    %9 = arith.truncf %8 : vector<16x128xf32> to vector<16x128xbf16>
    %c0_5 = arith.constant 0 : index
    %c0_6 = arith.constant 0 : index
    %10 = vector.load %arg3[%c0_5, %c0_6] : memref<128x128xbf16, #tpu.memory_space<vmem>>, vector<128x128xbf16>
    %cst_7 = arith.constant dense<0.000000e+00> : vector<16x128xf32>
    %11 = tpu.matmul %9, %10, %cst_7 {dimension_numbers = #tpu.dot_dimension_numbers<[1], [0], [0], [1], [0, 0, 1, 1], [], []>} : vector<16x128xbf16>, vector<128x128xbf16>, vector<16x128xf32> -> vector<16x128xf32>
    %12 = tpu.iota {dimensions = array<i32: 1>} : vector<16x128xi32>
    %c2_i32 = arith.constant 2 : i32
    %13 = vector.broadcast %c2_i32 : i32 to vector<16x128xi32>
    %14 = arith.cmpi sge, %12, %13 : vector<16x128xi32>
    %c4_i32 = arith.constant 4 : i32
    %15 = vector.broadcast %c4_i32 : i32 to vector<16x128xi32>
    %16 = arith.cmpi slt, %12, %15 : vector<16x128xi32>
    %17 = arith.andi %14, %16 : vector<16x128xi1>
    %18 = arith.select %17, %8, %11 : vector<16x128xi1>, vector<16x128xf32>
    %19 = arith.truncf %18 : vector<16x128xf32> to vector<16x128xbf16>
    %c0_8 = arith.constant 0 : index
    %c0_9 = arith.constant 0 : index
    %20 = vector.load %arg4[%c0_8, %c0_9] : memref<16x128xbf16, #tpu.memory_space<vmem>>, vector<16x128xbf16>
    tpu.vector_store %arg4[%c0_8, %c0_9], %19 {strides = array<i32>} : memref<16x128xbf16, #tpu.memory_space<vmem>>, vector<16x128xbf16>,
    return
  }
  func.func @transform_0(%arg0: i32) -> (i32, i32) {
    %c0_i32 = arith.constant 0 : i32
    %c0_i32_0 = arith.constant 0 : i32
    return %arg0, %c0_i32 : i32, i32
  }
  func.func @transform_1(%arg0: i32) -> (i32, i32) {
    %c0_i32 = arith.constant 0 : i32
    %c0_i32_0 = arith.constant 0 : i32
    %c0_i32_1 = arith.constant 0 : i32
    return %c0_i32, %c0_i32_0 : i32, i32
  }
  func.func @transform_2(%arg0: i32) -> (i32, i32) {
    %c0_i32 = arith.constant 0 : i32
    %c0_i32_0 = arith.constant 0 : i32
    %c0_i32_1 = arith.constant 0 : i32
    return %c0_i32, %c0_i32_0 : i32, i32
  }
  func.func @transform_3(%arg0: i32) -> (i32, i32) {
    %c0_i32 = arith.constant 0 : i32
    %c0_i32_0 = arith.constant 0 : i32
    return %arg0, %c0_i32 : i32, i32
  }
}

</mosaic_0001>

<bundles_post_ra>
// kernel: tpu_custom_call.1
= control target key start
LH: loop header
LB: loop body
LE: loop exit
PB: predicated region body
PF: predicated region fallthrough
CT: control target
= control target key end

     0   :  { %8 = vsyncpa [#allocation3], 0  ;;  %s666_s0 = inlined_call_operand.hbm [shape: f32[8,224], index: 0, kind: input, shape index: {}]   ;;  %s667_s1 = inlined_call_operand.hbm [shape: bf16[224,128], index: 1, kind: input, shape index: {}]   ;;  %s668_s2 = inlined_call_operand.hbm [shape: bf16[128,128], index: 2, kind: input, shape index: {}]   ;;  %s669_s3 = inlined_call_operand.hbm [shape: bf16[8,128], index: 3, kind: output, shape index: {}]  }
   0x1   :  { %9 = vsyncpa [#allocation6], 0 }
   0x2   :  { %10 = vsyncpa [#allocation4], 0 }
   0x3   :  { %15 = vsyncadd [#allocation3], 256  ;;  %s555_s12 = smov [#allocation5]   ;;  %s461_s16 = scalar_lea.hbm %s667_s1, 1792 }
   0x4   :  { %s28_s13 = sshll.u32 %s555_s12, 4  ;;  %p462_p0 = scmp.ne.s32.totalorder %s667_s1, %s461_s16  ;;  %s29_s13 = int_to_ptr.vmem [resolvable:$true] %s28_s13 }
   0x5   :  { %p465_p1 = scmp.lt.u32.totalorder %s461_s16, %s667_s1 }
   0x7   :  { %p467_p2 = pnand %p465_p1, %p462_p0 }
   0x9   :  { %470 = shalt.err (!%p467_p2)
}
   0xa   :  { %s471_s21 = scalar_lea.vmem %s29_s13, 1792  ;;  %p476_p4 = scmp.lt.s32.totalorder %s29_s13, %s29_s13 }
   0xb   :  { %p472_p3 = scmp.ne.s32.totalorder %s29_s13, %s471_s21  ;;  %p477_p5 = scmp.lt.s32.totalorder %s471_s21, %s471_s21 }
   0xd   :  { %p478_p6 = por %p477_p5, %p476_p4 }
   0xf   :  { %p479_p7 = pnand %p478_p6, %p472_p3 }
  0x11   :  { %482 = shalt.err (!%p479_p7)
}
  0x12   :  { %s556_s22 = smov 64   ;;  %s557_s23 = smov 4  }
  0x13   :  { %34 = dma.hbm_to_vmem [thread:$0]  %s667_s1, 1792, %s29_s13, [#allocation6], %s556_s22, %s556_s22, %s557_s23  }
  0x14   :  { %s558_s26 = smov [#allocation2]   ;;  %s483_s30 = scalar_lea.hbm %s666_s0, 256 }
  0x15   :  { %s16_s27 = sshll.u32 %s558_s26, 4  ;;  %p484_p8 = scmp.ne.s32.totalorder %s666_s0, %s483_s30  ;;  %s17_s27 = int_to_ptr.vmem [resolvable:$true] %s16_s27 }
  0x16   :  { %p487_p9 = scmp.lt.u32.totalorder %s483_s30, %s666_s0 }
  0x18   :  { %p489_p10 = pnand %p487_p9, %p484_p8 }
  0x1a   :  { %492 = shalt.err (!%p489_p10)
}
  0x1b   :  { %s493_s8 = scalar_lea.vmem %s17_s27, 256  ;;  %s497_s1 = scalar_lea.vmem %s17_s27, 512 }
  0x1c   :  { %p494_p11 = scmp.ne.s32.totalorder %s17_s27, %s493_s8  ;;  %p498_p12 = scmp.lt.s32.totalorder %s17_s27, %s17_s27 }
  0x1d   :  { %p499_p13 = scmp.lt.s32.totalorder %s497_s1, %s493_s8 }
  0x1f   :  { %p500_p0 = por %p499_p13, %p498_p12 }
  0x21   :  { %p501_p1 = pnand %p500_p0, %p494_p11 }
  0x23   :  { %504 = shalt.err (!%p501_p1)
}
  0x24   :  { %s559_s9 = smov 256   ;;  %s560_s10 = smov 16  }
  0x25   :  { %22 = dma.hbm_to_vmem [thread:$0]  %s666_s0, 256, %s17_s27, [#allocation3], %s559_s9, %s559_s9, %s560_s10  }
  0x26   :  { %s561_s13 = smov [#allocation7]   ;;  %s505_s17 = scalar_lea.hbm %s668_s2, 1024 }
  0x27   :  { %s40_s14 = sshll.u32 %s561_s13, 4  ;;  %p506_p2 = scmp.ne.s32.totalorder %s668_s2, %s505_s17  ;;  %s41_s14 = int_to_ptr.vmem [resolvable:$true] %s40_s14 }
  0x28   :  { %p509_p3 = scmp.lt.u32.totalorder %s505_s17, %s668_s2 }
  0x2a   :  { %p511_p4 = pnand %p509_p3, %p506_p2 }
  0x2c   :  { %514 = shalt.err (!%p511_p4)
}
  0x2d   :  { %s515_s24 = scalar_lea.vmem %s41_s14, 1024  ;;  %p520_p6 = scmp.lt.s32.totalorder %s41_s14, %s41_s14 }
  0x2e   :  { %p516_p5 = scmp.ne.s32.totalorder %s41_s14, %s515_s24  ;;  %p521_p7 = scmp.lt.s32.totalorder %s515_s24, %s515_s24 }
  0x30   :  { %p522_p8 = por %p521_p7, %p520_p6 }
  0x32   :  { %p523_p9 = pnand %p522_p8, %p516_p5 }
  0x34   :  { %526 = shalt.err (!%p523_p9)
}
  0x35   :  { %46 = dma.hbm_to_vmem [thread:$0]  %s668_s2, 1024, %s41_s14, [#allocation6], %s556_s22, %s556_s22, %s557_s23  }
  0x36   :  { %549 = dma.done.wait [#allocation3], 512  }
  0x37   :  { %550 = vsyncadd [#allocation3], 4294966784 }
  0x38   :  { %551 = dma.done.wait [#allocation6], 2816  }
  0x39   :  { %552 = vsyncadd [#allocation6], 4294964480  ;;  %v562_v0 = vmov 0   ;;  %v563_v1 = vmov 0.0   ;;  %v439_v2 = vld [vmem:[#allocation5] sm:$0xff]   ;;  %v440_v3 = vld [vmem:[#allocation5 + $0x8] sm:$0xff]   ;;  %v332_v39 = vlaneseq }
  0x3a   :  { %179 = vmatprep.subr.bf16.mxu0 %v562_v0  ;;  %408 = vmatprep.subr.bf16.mxu1 %v563_v1  ;;  %v441_v4 = vld [vmem:[#allocation5 + $0x10] sm:$0xff]   ;;  %v442_v5 = vld [vmem:[#allocation5 + $0x18] sm:$0xff]   ;;  %v443_v6 = vld [vmem:[#allocation5 + $0x20] sm:$0xff]   ;;  %vm175_vm0 = vcmask 785408   ;;  %vm564_vm1 = vmmov 0  }
  0x3b   :  { %180 = vmatpush1.bf16.msra.mxu0 %v439_v2  ;;  %v58_v7 = vld [vmem:[#allocation2 + $0x8] sm:$0xff]  ;;  %v60_v8 = vld [vmem:[#allocation2 + $0x18] sm:$0xff]  ;;  %v453_v10 = vld [vmem:[#allocation7] sm:$0xff]   ;;  %424 = vmatprep.mubr.msk.bf16.mxu1 %vm564_vm1, %v563_v1  ;;  %v333_v40 = vand.u32 127, %v332_v39 }
  0x3c   :  { %181 = vmatprep.subr.bf16.mxu0 %v562_v0  ;;  %v62_v9 = vpack.c.bf16 %v60_v8, %v58_v7  ;;  %v444_v11 = vld [vmem:[#allocation5 + $0x28] sm:$0xff]   ;;  %409 = vmatpush3.bf16.msra.mxu1 %v453_v10  ;;  %v454_v12 = vld [vmem:[#allocation7 + $0x8] sm:$0xff]   ;;  %v445_v13 = vld [vmem:[#allocation5 + $0x30] sm:$0xff]  }
  0x3d   :  { %410 = vmatprep.subr.bf16.mxu1 %v563_v1  ;;  %v455_v14 = vld [vmem:[#allocation7 + $0x10] sm:$0xff]   ;;  %v446_v15 = vld [vmem:[#allocation5 + $0x38] sm:$0xff]   ;;  %v456_v16 = vld [vmem:[#allocation7 + $0x18] sm:$0xff]   ;;  %vm334_vm4 = vcmp.ge.s32.totalorder %v333_v40, 2  ;;  %vm335_vm5 = vcmp.lt.s32.totalorder %v333_v40, 4 }
  0x3e   :  { %381 = vmatprep.mubr.msk.bf16.mxu0 %vm175_vm0, %v62_v9  ;;  %v447_v17 = vld [vmem:[#allocation5 + $0x40] sm:$0xff]   ;;  %v457_v18 = vld [vmem:[#allocation7 + $0x20] sm:$0xff]   ;;  %v448_v19 = vld [vmem:[#allocation5 + $0x48] sm:$0xff]  }
  0x3f   :  { %182 = vmatpush1.bf16.msra.mxu0 %v440_v3  ;;  %v458_v20 = vld [vmem:[#allocation7 + $0x28] sm:$0xff]   ;;  %v449_v21 = vld [vmem:[#allocation5 + $0x50] sm:$0xff]   ;;  %v451_v23 = vld [vmem:[#allocation5 + $0x60] sm:$0xff]  }
  0x40   :  { %183 = vmatprep.subr.bf16.mxu0 %v562_v0  ;;  %411 = vmatpush3.bf16.msra.mxu1 %v454_v12  ;;  %v450_v22 = vld [vmem:[#allocation5 + $0x58] sm:$0xff]   ;;  %v452_v24 = vld [vmem:[#allocation5 + $0x68] sm:$0xff]   ;;  %v57_v25 = vld [vmem:[#allocation2] sm:$0xff] }
  0x41   :  { %412 = vmatprep.subr.bf16.mxu1 %v563_v1  ;;  %v59_v26 = vld [vmem:[#allocation2 + $0x10] sm:$0xff]  ;;  %v459_v28 = vld [vmem:[#allocation7 + $0x30] sm:$0xff]   ;;  %v460_v29 = vld [vmem:[#allocation7 + $0x38] sm:$0xff]  }
  0x42   :  { %v61_v27 = vpack.c.bf16 %v59_v26, %v57_v25  ;;  %vm336_vm6 = vmand %vm334_vm4, %vm335_vm5 }
  0x43   :  { %184 = vmatpush1.bf16.msra.mxu0 %v441_v4 }
  0x44   :  { %185 = vmatprep.subr.bf16.mxu0 %v562_v0  ;;  %413 = vmatpush3.bf16.msra.mxu1 %v455_v14 }
  0x45   :  { %414 = vmatprep.subr.bf16.mxu1 %v563_v1 }
  0x47   :  { %186 = vmatpush1.bf16.msra.mxu0 %v442_v5 }
  0x48   :  { %187 = vmatprep.subr.bf16.mxu0 %v562_v0  ;;  %415 = vmatpush3.bf16.msra.mxu1 %v456_v16 }
  0x49   :  { %416 = vmatprep.subr.bf16.mxu1 %v563_v1 }
  0x4b   :  { %188 = vmatpush1.bf16.msra.mxu0 %v443_v6 }
  0x4c   :  { %189 = vmatprep.subr.bf16.mxu0 %v562_v0  ;;  %417 = vmatpush3.bf16.msra.mxu1 %v457_v18 }
  0x4d   :  { %418 = vmatprep.subr.bf16.mxu1 %v563_v1 }
  0x4f   :  { %190 = vmatpush1.bf16.msra.mxu0 %v444_v11 }
  0x50   :  { %191 = vmatprep.subr.bf16.mxu0 %v562_v0  ;;  %419 = vmatpush3.bf16.msra.mxu1 %v458_v20 }
  0x51   :  { %420 = vmatprep.subr.bf16.mxu1 %v563_v1 }
  0x53   :  { %192 = vmatpush1.bf16.msra.mxu0 %v445_v13 }
  0x54   :  { %193 = vmatprep.subr.bf16.mxu0 %v562_v0  ;;  %421 = vmatpush3.bf16.msra.mxu1 %v459_v28 }
  0x55   :  { %422 = vmatprep.subr.bf16.mxu1 %v563_v1 }
  0x57   :  { %194 = vmatpush1.bf16.msra.mxu0 %v446_v15 }
  0x58   :  { %195 = vmatprep.subr.bf16.mxu0 %v562_v0  ;;  %423 = vmatpush3.bf16.msra.mxu1 %v460_v29 }
  0x5b   :  { %196 = vmatpush1.bf16.msra.mxu0 %v447_v17 }
  0x5c   :  { %197 = vmatprep.subr.bf16.mxu0 %v562_v0 }
  0x5f   :  { %198 = vmatpush1.bf16.msra.mxu0 %v448_v19 }
  0x60   :  { %199 = vmatprep.subr.bf16.mxu0 %v562_v0 }
  0x63   :  { %200 = vmatpush1.bf16.msra.mxu0 %v449_v21 }
  0x64   :  { %201 = vmatprep.subr.bf16.mxu0 %v562_v0 }
  0x67   :  { %202 = vmatpush1.bf16.msra.mxu0 %v450_v22 }
  0x68   :  { %203 = vmatprep.subr.bf16.mxu0 %v562_v0 }
  0x6b   :  { %204 = vmatpush1.bf16.msra.mxu0 %v451_v23 }
  0x6c   :  { %205 = vmatprep.subr.bf16.mxu0 %v562_v0 }
  0x6f   :  { %206 = vmatpush1.bf16.msra.mxu0 %v452_v24 }
  0x72   :  { %212 = vmatmul.mubr.bf16.vlgmr.msra.gmra.mrb[0].mxu0 %v61_v27 }
 0x145   :  { %v213_v30 = vpop.f32.mrb[0].mxu0 }
 0x146   :  { %v222_v31 = vmul.f32 0.3, %v213_v30  ;;  %v215_v32 = vpop.f32.mrb[1].mxu0  ;;  %vm220_vm2 = vcmp.gt.f32.partialorder %v213_v30, 0.0 }
 0x147   :  { %v216_v33 = vpop.f32.mrb[2].mxu0 }
 0x148   :  { %vm221_vm3 = vcmp.gt.f32.partialorder %v216_v33, 0.0  ;;  %v223_v34 = vmul.f32 0.3, %v216_v33  ;;  %v218_v35 = vpop.f32.mrb[3].mxu0  ;;  %v224_v36 = vsel %vm220_vm2, %v213_v30, %v222_v31 }
 0x14a   :  { %v225_v37 = vsel %vm221_vm3, %v216_v33, %v223_v34 }
 0x14b   :  { %v226_v38 = vpack.c.bf16 %v225_v37, %v224_v36 }
 0x14d   :  { %425 = vmatmul.mubr.bf16.vlgmr.msra.gmra.mrb[0].mxu1 %v226_v38 }
 0x220   :  { %v325_v41 = vpop.f32.mrb[0].mxu1 }
 0x221   :  { %v426_v42 = vpop.f32.mrb[1].mxu1  ;;  %v337_v44 = vsel %vm336_vm6, %v224_v36, %v325_v41 }
 0x222   :  { %v328_v43 = vpop.f32.mrb[2].mxu1 }
 0x223   :  { %v338_v45 = vsel %vm336_vm6, %v225_v37, %v328_v43  ;;  %v427_v46 = vpop.f32.mrb[3].mxu1 }
 0x224   :  { %v397_v47 = vpack.c.bf16 %v338_v45, %v337_v44 }
 0x226   :  { %398 = vst [vmem:[#allocation8] sm:$0xff] %v397_v47  }
 0x227   :  { %353 = vsyncadd [#allocation4], 64  ;;  %s565_s2 = smov [#allocation8]  }
 0x228   :  { %s354_s26 = sshll.u32 %s565_s2, 4  ;;  %s355_s26 = int_to_ptr.vmem [resolvable:$true] %s354_s26 }
 0x229   :  { %s527_s27 = scalar_lea.vmem %s355_s26, 64  ;;  %s531_s28 = scalar_lea.vmem %s355_s26, 128 }
 0x22a   :  { %p528_p10 = scmp.ne.s32.totalorder %s355_s26, %s527_s27  ;;  %p532_p11 = scmp.lt.s32.totalorder %s355_s26, %s355_s26 }
 0x22b   :  { %p533_p12 = scmp.lt.s32.totalorder %s531_s28, %s527_s27 }
 0x22d   :  { %p534_p13 = por %p533_p12, %p532_p11 }
 0x22f   :  { %p535_p0 = pnand %p534_p13, %p528_p10 }
 0x231   :  { %538 = shalt.err (!%p535_p0)
}
 0x232   :  { %s539_s4 = scalar_lea.hbm %s669_s3, 64 }
 0x233   :  { %p540_p1 = scmp.ne.s32.totalorder %s669_s3, %s539_s4  ;;  %p543_p2 = scmp.lt.u32.totalorder %s539_s4, %s669_s3 }
 0x235   :  { %p545_p3 = pnand %p543_p2, %p540_p1 }
 0x237   :  { %548 = shalt.err (!%p545_p3)
}
 0x238   :  { %360 = dma.vmem_to_hbm [thread:$0]  %s355_s26, 64, %s669_s3, [#allocation4], %s556_s22, %s556_s22, %s557_s23  }
 0x239   :  { %553 = dma.done.wait [#allocation4], 128  }
 0x23a   :  { %554 = vsyncadd [#allocation4], 4294967168 }
 0x23b   :  { %364 = vsyncpa [#allocation3], 1 }
 0x23c   :  { %365 = vsyncpa [#allocation6], 1 }
 0x23d   :  { %366 = vsyncpa [#allocation4], 1 }

</bundles_post_ra>
